<compile_context>
chip_gen: v5e
topology: v5e:2x2
jax: 0.10.0
libtpu: 0.0.40
codegen_flags: <defaults>
</compile_context>

<pallas_src>
import jax
import jax.numpy as jnp
from jax import lax
from jax.experimental import pallas as pl
from jax.experimental.pallas import tpu as pltpu

# ------------------------- static configuration -------------------------
B = 2            # batch
C_IN = 4         # input channels
H = W = 16       # spatial
HIDDEN = 8       # base-model conv channels
CLASS_NUM = 4    # per-model output width
NUM_MODELS = 4   # ensemble size (independent of CLASS_NUM now)
HW = H * W
CK = C_IN * 9                  # im2col row width for a 3x3 conv
MF = NUM_MODELS * HIDDEN       # packed feature width


# ------------------------- Pallas kernel ---------------------------------
def _ensemble_kernel(p_ref, w1_ref, b1_ref, w2_ref, b2_ref, out_ref):
    """Entire ensemble fused in one invocation:
    packed conv3x3 (im2col matmul) -> ReLU -> global average pool ->
    packed, pre-averaged Linear heads."""
    # p_ref:(B,HW,CK)  w1_ref:(CK,MF)  b1_ref:(1,MF)
    # w2_ref:(MF,CLASS_NUM)  b2_ref:(1,CLASS_NUM)  out_ref:(B,CLASS_NUM)
    h = jnp.einsum("bpc,cf->bpf", p_ref[...], w1_ref[...],
                   preferred_element_type=jnp.float32)      # one MXU matmul for all models
    h = jnp.maximum(h + b1_ref[...], 0.0)                   # conv bias + ReLU (f32 VPU)
    pooled = jnp.mean(h, axis=1)                            # global avg pool -> (B, MF)
    # block-stacked Linear weights already carry the 1/NUM_MODELS ensemble average
    out_ref[...] = jnp.dot(pooled, w2_ref[...],
                           preferred_element_type=jnp.float32) + b2_ref[...]


# ------------------------- glue / wrapper --------------------------------
def _im2col_3x3(x):
    """(B, C, H, W) -> (B, H*W, C*9) patches for a padding=1, stride=1 conv."""
    b, c, h, w = x.shape
    xp = jnp.pad(x, ((0, 0), (0, 0), (1, 1), (1, 1)))
    cols = [xp[:, :, dy:dy + h, dx:dx + w] for dy in range(3) for dx in range(3)]
    p = jnp.stack(cols, axis=2)                              # (B, C, 9, H, W)
    return p.transpose(0, 3, 4, 1, 2).reshape(b, h * w, c * 9)


def _pack_params(params):
    """Pack all NUM_MODELS members into single matrices; fold the ensemble
    average into the Linear weights."""
    # conv: (M, HIDDEN, C, 3, 3) -> (M, C*9, HIDDEN) -> (C*9, M*HIDDEN)
    w1 = params["conv_w"].transpose(0, 2, 3, 4, 1).reshape(NUM_MODELS, CK, HIDDEN)
    w1 = w1.transpose(1, 0, 2).reshape(CK, MF)
    b1 = params["conv_b"].reshape(1, MF)
    # linear: block-stack (M, CLASS_NUM, HIDDEN) -> (M*HIDDEN, CLASS_NUM), pre-scale by 1/M
    w2 = params["lin_w"].transpose(0, 2, 1).reshape(MF, CLASS_NUM) / NUM_MODELS
    b2 = jnp.mean(params["lin_b"], axis=0).reshape(1, CLASS_NUM)
    return w1, b1, w2, b2


def average_ensemble_forward(x, params):
    patches = _im2col_3x3(x).astype(jnp.float32)             # (B, HW, CK) ~73 KB
    w1, b1, w2, b2 = _pack_params(params)
    return pl.pallas_call(
        _ensemble_kernel,
        out_shape=jax.ShapeDtypeStruct((B, CLASS_NUM), jnp.float32),
        grid=(1,),
        in_specs=[
            pl.BlockSpec((B, HW, CK), lambda i: (0, 0, 0)),
            pl.BlockSpec((CK, MF), lambda i: (0, 0)),
            pl.BlockSpec((1, MF), lambda i: (0, 0)),
            pl.BlockSpec((MF, CLASS_NUM), lambda i: (0, 0)),
            pl.BlockSpec((1, CLASS_NUM), lambda i: (0, 0)),
        ],
        out_specs=pl.BlockSpec((B, CLASS_NUM), lambda i: (0, 0)),
        compiler_params=pltpu.CompilerParams(dimension_semantics=("parallel",)),
    )(patches, w1, b1, w2, b2)


# ------------------------- pure-JAX reference (for verification) ---------
def reference_forward(x, params):
    """Literal AverageEnsembleModel.forward: mean over per-model outputs."""
    outs = []
    for m in range(NUM_MODELS):
        y = lax.conv_general_dilated(
            x, params["conv_w"][m], window_strides=(1, 1),
            padding=((1, 1), (1, 1)),
            dimension_numbers=("NCHW", "OIHW", "NCHW"))
        y = jnp.maximum(y + params["conv_b"][m][None, :, None, None], 0.0)
        pooled = jnp.mean(y, axis=(2, 3))
        outs.append(pooled @ params["lin_w"][m].T + params["lin_b"][m])
    return sum(outs) / NUM_MODELS


# ------------------------- main ------------------------------------------
if __name__ == "__main__":
    key = jax.random.PRNGKey(0)
    ks = jax.random.split(key, 5)
    params = {
        "conv_w": 0.1 * jax.random.normal(ks[0], (NUM_MODELS, HIDDEN, C_IN, 3, 3), jnp.float32),
        "conv_b": 0.1 * jax.random.normal(ks[1], (NUM_MODELS, HIDDEN), jnp.float32),
        "lin_w":  0.1 * jax.random.normal(ks[2], (NUM_MODELS, CLASS_NUM, HIDDEN), jnp.float32),
        "lin_b":  0.1 * jax.random.normal(ks[3], (NUM_MODELS, CLASS_NUM), jnp.float32),
    }
    x = jax.random.normal(ks[4], (B, C_IN, H, W), jnp.float32)

    fwd = jax.jit(average_ensemble_forward)
    out = jax.block_until_ready(fwd(x, params))
    ref = jax.block_until_ready(reference_forward(x, params))

    assert out.shape == (B, CLASS_NUM)
    if not jnp.allclose(out, ref, atol=1e-4, rtol=1e-4):
        raise AssertionError("Pallas output mismatch vs JAX reference")
    print("KERNEL_OK")
</pallas_src>

<mosaic_0001>
module attributes {stable_mosaic.version = 11 : i64} {
  func.func @_ensemble_kernel(%arg0: i32, %arg1: memref<2x256x36xf32, #tpu.memory_space<vmem>>, %arg2: memref<36x32xf32, #tpu.memory_space<vmem>>, %arg3: memref<1x32xf32, #tpu.memory_space<vmem>>, %arg4: memref<32x4xf32, #tpu.memory_space<vmem>>, %arg5: memref<1x4xf32, #tpu.memory_space<vmem>>, %arg6: memref<2x4xf32, #tpu.memory_space<vmem>>) attributes {dimension_semantics = [#tpu.dimension_semantics<parallel>], iteration_bounds = array<i64: 1>, scalar_prefetch = 0 : i64, scratch_operands = 0 : i64, tpu.core_type = #tpu.core_type<tc>, window_params = [{pipeline_mode = #tpu.pipeline_mode<synchronous>, transform_indices = @transform_0, window_bounds = array<i64: 2, 256, 36>}, {pipeline_mode = #tpu.pipeline_mode<synchronous>, transform_indices = @transform_1, window_bounds = array<i64: 36, 32>}, {pipeline_mode = #tpu.pipeline_mode<synchronous>, transform_indices = @transform_2, window_bounds = array<i64: 1, 32>}, {pipeline_mode = #tpu.pipeline_mode<synchronous>, transform_indices = @transform_3, window_bounds = array<i64: 32, 4>}, {pipeline_mode = #tpu.pipeline_mode<synchronous>, transform_indices = @transform_4, window_bounds = array<i64: 1, 4>}, {pipeline_mode = #tpu.pipeline_mode<synchronous>, transform_indices = @transform_5, window_bounds = array<i64: 2, 4>}]} {
    %c0 = arith.constant 0 : index
    %c0_0 = arith.constant 0 : index
    %c0_1 = arith.constant 0 : index
    %0 = vector.load %arg1[%c0, %c0_0, %c0_1] : memref<2x256x36xf32, #tpu.memory_space<vmem>>, vector<2x256x36xf32>
    %c0_2 = arith.constant 0 : index
    %c0_3 = arith.constant 0 : index
    %1 = vector.load %arg2[%c0_2, %c0_3] : memref<36x32xf32, #tpu.memory_space<vmem>>, vector<36x32xf32>
    "tpu.trace_start"() <{level = 10 : i32, message = "bpc,cf->bpf"}> : () -> ()
    %cst = arith.constant dense<0.000000e+00> : vector<2x256x32xf32>
    %2 = tpu.matmul %0, %1, %cst {dimension_numbers = #tpu.dot_dimension_numbers<[2], [0], [0, 1], [1], [0, 0, 0, 1, 1, 1], [], []>} : vector<2x256x36xf32>, vector<36x32xf32>, vector<2x256x32xf32> -> vector<2x256x32xf32>
    "tpu.trace_stop"() : () -> ()
    %c0_4 = arith.constant 0 : index
    %c0_5 = arith.constant 0 : index
    %3 = vector.load %arg3[%c0_4, %c0_5] : memref<1x32xf32, #tpu.memory_space<vmem>>, vector<1x32xf32>
    %4 = vector.shape_cast %3 : vector<1x32xf32> to vector<1x1x32xf32>
    %5 = vector.broadcast %4 : vector<1x1x32xf32> to vector<2x256x32xf32>
    %6 = arith.addf %2, %5 : vector<2x256x32xf32>
    %cst_6 = arith.constant 0.000000e+00 : f32
    %7 = vector.broadcast %cst_6 : f32 to vector<2x256x32xf32>
    %8 = arith.maximumf %6, %7 : vector<2x256x32xf32>
    %cst_7 = arith.constant dense<0.000000e+00> : vector<2x32xf32>
    %9 = vector.multi_reduction <add>, %8, %cst_7 [1] : vector<2x256x32xf32> to vector<2x32xf32>
    %cst_8 = arith.constant 2.560000e+02 : f32
    %10 = vector.broadcast %cst_8 : f32 to vector<2x32xf32>
    %11 = arith.divf %9, %10 : vector<2x32xf32>
    %c0_9 = arith.constant 0 : index
    %c0_10 = arith.constant 0 : index
    %12 = vector.load %arg4[%c0_9, %c0_10] : memref<32x4xf32, #tpu.memory_space<vmem>>, vector<32x4xf32>
    %cst_11 = arith.constant dense<0.000000e+00> : vector<2x4xf32>
    %13 = tpu.matmul %11, %12, %cst_11 {dimension_numbers = #tpu.dot_dimension_numbers<[1], [0], [0], [1], [0, 0, 1, 1], [], []>} : vector<2x32xf32>, vector<32x4xf32>, vector<2x4xf32> -> vector<2x4xf32>
    %c0_12 = arith.constant 0 : index
    %c0_13 = arith.constant 0 : index
    %14 = vector.load %arg5[%c0_12, %c0_13] : memref<1x4xf32, #tpu.memory_space<vmem>>, vector<1x4xf32>
    %15 = vector.broadcast %14 : vector<1x4xf32> to vector<2x4xf32>
    %16 = arith.addf %13, %15 : vector<2x4xf32>
    %c0_14 = arith.constant 0 : index
    %c0_15 = arith.constant 0 : index
    %17 = vector.load %arg6[%c0_14, %c0_15] : memref<2x4xf32, #tpu.memory_space<vmem>>, vector<2x4xf32>
    tpu.vector_store %arg6[%c0_14, %c0_15], %16 {strides = array<i32>} : memref<2x4xf32, #tpu.memory_space<vmem>>, vector<2x4xf32>,
    return
  }
  func.func @transform_0(%arg0: i32) -> (i32, i32, i32) {
    %c0_i32 = arith.constant 0 : i32
    %c0_i32_0 = arith.constant 0 : i32
    %c0_i32_1 = arith.constant 0 : i32
    %c0_i32_2 = arith.constant 0 : i32
    return %c0_i32, %c0_i32_0, %c0_i32_1 : i32, i32, i32
  }
  func.func @transform_1(%arg0: i32) -> (i32, i32) {
    %c0_i32 = arith.constant 0 : i32
    %c0_i32_0 = arith.constant 0 : i32
    %c0_i32_1 = arith.constant 0 : i32
    return %c0_i32, %c0_i32_0 : i32, i32
  }
  func.func @transform_2(%arg0: i32) -> (i32, i32) {
    %c0_i32 = arith.constant 0 : i32
    %c0_i32_0 = arith.constant 0 : i32
    %c0_i32_1 = arith.constant 0 : i32
    return %c0_i32, %c0_i32_0 : i32, i32
  }
  func.func @transform_3(%arg0: i32) -> (i32, i32) {
    %c0_i32 = arith.constant 0 : i32
    %c0_i32_0 = arith.constant 0 : i32
    %c0_i32_1 = arith.constant 0 : i32
    return %c0_i32, %c0_i32_0 : i32, i32
  }
  func.func @transform_4(%arg0: i32) -> (i32, i32) {
    %c0_i32 = arith.constant 0 : i32
    %c0_i32_0 = arith.constant 0 : i32
    %c0_i32_1 = arith.constant 0 : i32
    return %c0_i32, %c0_i32_0 : i32, i32
  }
  func.func @transform_5(%arg0: i32) -> (i32, i32) {
    %c0_i32 = arith.constant 0 : i32
    %c0_i32_0 = arith.constant 0 : i32
    %c0_i32_1 = arith.constant 0 : i32
    return %c0_i32, %c0_i32_0 : i32, i32
  }
}

</mosaic_0001>

<bundles_post_ra>
// kernel: average_ensemble_forward.1
= control target key start
LH: loop header
LB: loop body
LE: loop exit
PB: predicated region body
PF: predicated region fallthrough
CT: control target
= control target key end

     0   :  { %vm287_vm0 = vcmask 1043456   ;;  %s1425_s0 = inlined_call_operand.vmem [shape: f32[2,256,36], index: 0, kind: input, shape index: {}]   ;;  %s1426_s1 = inlined_call_operand.vmem [shape: f32[36,32], index: 1, kind: input, shape index: {}]   ;;  %s1427_s2 = inlined_call_operand.vmem [shape: f32[1,32], index: 2, kind: input, shape index: {}]   ;;  %s1428_s3 = inlined_call_operand.vmem [shape: f32[32,4], index: 3, kind: input, shape index: {}]   ;;  %s1429_s4 = inlined_call_operand.vmem [shape: f32[1,4], index: 4, kind: input, shape index: {}]   ;;  %s1430_s5 = inlined_call_operand.hbm [shape: f32[2,4], index: 5, kind: output, shape index: {}]  }
   0x1   :  { %v89_v0 = vld [vmem:[%s1426_s1 + $0x20] sm:$0xf]  ;;  %v88_v1 = vld [vmem:[%s1426_s1 + $0x18] sm:$0xff]  ;;  %v87_v2 = vld [vmem:[%s1426_s1 + $0x10] sm:$0xff] }
   0x2   :  { %764 = vmatpush.msk.msra.mxu0 %vm287_vm0, %v89_v0  ;;  %831 = vmatpush.msk.msra.mxu2 %vm287_vm0, %v89_v0  ;;  %v86_v3 = vld [vmem:[%s1426_s1 + $0x8] sm:$0xff] }
   0x3   :  { %832 = vmatpush.msk.msra.mxu3 %vm287_vm0, %v89_v0  ;;  %830 = vmatpush.msk.msra.mxu1 %vm287_vm0, %v89_v0 }
   0x4   :  { %303 = vmatpush.msra.mxu0 %v88_v1  ;;  %834 = vmatpush.msra.mxu2 %v88_v1 }
   0x5   :  { %835 = vmatpush.msra.mxu3 %v88_v1  ;;  %833 = vmatpush.msra.mxu1 %v88_v1 }
   0x6   :  { %304 = vmatpush.msra.mxu0 %v87_v2  ;;  %837 = vmatpush.msra.mxu2 %v87_v2 }
   0x7   :  { %10 = vsyncpa [#allocation3], 0  ;;  %v85_v4 = vld [vmem:[%s1426_s1] sm:$0xff]  ;;  %838 = vmatpush.msra.mxu3 %v87_v2  ;;  %836 = vmatpush.msra.mxu1 %v87_v2  ;;  %vm94_vm1 = vcmask 293888   ;;  %v51_v6 = vld [vmem:[%s1425_s0 + $0xf0] sm:$0xff]  ;;  %vm564_vm2 = vcmask 261120  }
   0x8   :  { %305 = vmatpush.msra.mxu0 %v86_v3  ;;  %840 = vmatpush.msra.mxu2 %v86_v3  ;;  %v21_v5 = vld [vmem:[%s1425_s0] sm:$0xff]  ;;  %v68_v7 = vld [vmem:[%s1425_s0 + $0x178] sm:$0xff]  ;;  %v22_v8 = vld [vmem:[%s1425_s0 + $0x8] sm:$0xff]  ;;  %vm722_vm4 = vcmask 1041409   ;;  %s878_s9 = smov [#allocation2]   ;;  %s755_s13 = sshll.u32 %s1430_s5, 4  ;;  %s756_s13 = int_to_ptr.hbm [resolvable:$true] %s755_s13 }
   0x9   :  { %841 = vmatpush.msra.mxu3 %v86_v3  ;;  %839 = vmatpush.msra.mxu1 %v86_v3  ;;  %v52_v9 = vld [vmem:[%s1425_s0 + $0xf8] sm:$0xff]  ;;  %v69_v10 = vld [vmem:[%s1425_s0 + $0x180] sm:$0xff]  ;;  %v23_v12 = vld [vmem:[%s1425_s0 + $0x10] sm:$0xff]  ;;  %s753_s10 = sshll.u32 %s878_s9, 4  ;;  %vm746_vm5 = vcmask 25600   ;;  %s754_s10 = int_to_ptr.vmem [resolvable:$true] %s753_s10 }
   0xa   :  { %306 = vmatpush.msra.mxu0 %v85_v4  ;;  %843 = vmatpush.msra.mxu2 %v85_v4  ;;  %v37_v11 = vld [vmem:[%s1425_s0 + $0x80] sm:$0xff]  ;;  %v70_v14 = vld [vmem:[%s1425_s0 + $0x188] sm:$0xff]  ;;  %v24_v16 = vld [vmem:[%s1425_s0 + $0x18] sm:$0xff] }
   0xb   :  { %765 = vmatmul.msk.f32.vlgmr.msra.gmra.mxu0 %vm94_vm1, %v21_v5  ;;  %795 = vmatmul.msk.f32.vlgmr.msra.gmra.mxu2 %vm94_vm1, %v51_v6  ;;  %v53_v13 = vld [vmem:[%s1425_s0 + $0x100] sm:$0xff]  ;;  %v38_v15 = vld [vmem:[%s1425_s0 + $0x88] sm:$0xff]  ;;  %v71_v18 = vld [vmem:[%s1425_s0 + $0x190] sm:$0xff] }
   0xc   :  { %844 = vmatpush.msra.mxu3 %v85_v4  ;;  %842 = vmatpush.msra.mxu1 %v85_v4  ;;  %v54_v17 = vld [vmem:[%s1425_s0 + $0x108] sm:$0xff]  ;;  %v39_v19 = vld [vmem:[%s1425_s0 + $0x90] sm:$0xff]  ;;  %v25_v20 = vld [vmem:[%s1425_s0 + $0x20] sm:$0xff] }
   0xd   :  { %812 = vmatmul.msk.f32.vlgmr.msra.gmra.mxu3 %vm94_vm1, %v68_v7  ;;  %781 = vmatmul.msk.f32.vlgmr.msra.gmra.mxu1 %vm94_vm1, %v37_v11  ;;  %v55_v21 = vld [vmem:[%s1425_s0 + $0x110] sm:$0xff]  ;;  %v72_v22 = vld [vmem:[%s1425_s0 + $0x198] sm:$0xff]  ;;  %v26_v24 = vld [vmem:[%s1425_s0 + $0x28] sm:$0xff] }
   0xe   :  { %v40_v23 = vld [vmem:[%s1425_s0 + $0x98] sm:$0xff]  ;;  %v73_v26 = vld [vmem:[%s1425_s0 + $0x1a0] sm:$0xff]  ;;  %v27_v28 = vld [vmem:[%s1425_s0 + $0x30] sm:$0xff] }
   0xf   :  { %v56_v25 = vld [vmem:[%s1425_s0 + $0x118] sm:$0xff]  ;;  %v41_v27 = vld [vmem:[%s1425_s0 + $0xa0] sm:$0xff]  ;;  %v74_v30 = vld [vmem:[%s1425_s0 + $0x1a8] sm:$0xff] }
  0x10   :  { %v57_v29 = vld [vmem:[%s1425_s0 + $0x120] sm:$0xff]  ;;  %v42_v31 = vld [vmem:[%s1425_s0 + $0xa8] sm:$0xff]  ;;  %v28_v32 = vld [vmem:[%s1425_s0 + $0x38] sm:$0xff] }
  0x11   :  { %v58_v33 = vld [vmem:[%s1425_s0 + $0x128] sm:$0xff]  ;;  %v75_v34 = vld [vmem:[%s1425_s0 + $0x1b0] sm:$0xff]  ;;  %v29_v36 = vld [vmem:[%s1425_s0 + $0x40] sm:$0xff] }
  0x12   :  { %v43_v35 = vld [vmem:[%s1425_s0 + $0xb0] sm:$0xff]  ;;  %v76_v38 = vld [vmem:[%s1425_s0 + $0x1b8] sm:$0xff]  ;;  %v30_v40 = vld [vmem:[%s1425_s0 + $0x48] sm:$0xff] }
  0x13   :  { %766 = vmatmul.msk.f32.gmra.mxu0 %vm94_vm1, %v22_v8  ;;  %796 = vmatmul.msk.f32.gmra.mxu2 %vm94_vm1, %v52_v9  ;;  %v59_v37 = vld [vmem:[%s1425_s0 + $0x130] sm:$0xff]  ;;  %v44_v39 = vld [vmem:[%s1425_s0 + $0xb8] sm:$0xff]  ;;  %v77_v42 = vld [vmem:[%s1425_s0 + $0x1c0] sm:$0xff] }
  0x14   :  { %v60_v41 = vld [vmem:[%s1425_s0 + $0x138] sm:$0xff]  ;;  %v45_v43 = vld [vmem:[%s1425_s0 + $0xc0] sm:$0xff]  ;;  %v31_v44 = vld [vmem:[%s1425_s0 + $0x50] sm:$0xff] }
  0x15   :  { %813 = vmatmul.msk.f32.gmra.mxu3 %vm94_vm1, %v69_v10  ;;  %782 = vmatmul.msk.f32.gmra.mxu1 %vm94_vm1, %v38_v15  ;;  %v61_v45 = vld [vmem:[%s1425_s0 + $0x140] sm:$0xff]  ;;  %v78_v46 = vld [vmem:[%s1425_s0 + $0x1c8] sm:$0xff]  ;;  %v32_v48 = vld [vmem:[%s1425_s0 + $0x58] sm:$0xff] }
  0x16   :  { %v46_v47 = vld [vmem:[%s1425_s0 + $0xc8] sm:$0xff]  ;;  %v79_v50 = vld [vmem:[%s1425_s0 + $0x1d0] sm:$0xff]  ;;  %v33_v52 = vld [vmem:[%s1425_s0 + $0x60] sm:$0xff] }
  0x17   :  { %v62_v49 = vld [vmem:[%s1425_s0 + $0x148] sm:$0xff]  ;;  %v47_v51 = vld [vmem:[%s1425_s0 + $0xd0] sm:$0xff]  ;;  %v80_v54 = vld [vmem:[%s1425_s0 + $0x1d8] sm:$0xff] }
  0x18   :  { %v63_v53 = vld [vmem:[%s1425_s0 + $0x150] sm:$0xff]  ;;  %v48_v55 = vld [vmem:[%s1425_s0 + $0xd8] sm:$0xff]  ;;  %v34_v56 = vld [vmem:[%s1425_s0 + $0x68] sm:$0xff] }
  0x19   :  { %v64_v57 = vld [vmem:[%s1425_s0 + $0x158] sm:$0xff]  ;;  %v81_v58 = vld [vmem:[%s1425_s0 + $0x1e0] sm:$0xff]  ;;  %v35_v60 = vld [vmem:[%s1425_s0 + $0x70] sm:$0xff] }
  0x1a   :  { %v49_v59 = vld [vmem:[%s1425_s0 + $0xe0] sm:$0xff]  ;;  %v82_v62 = vld [vmem:[%s1425_s0 + $0x1e8] sm:$0xff]  ;;  %v36_v0 = vld [vmem:[%s1425_s0 + $0x78] sm:$0xff] }
  0x1b   :  { %767 = vmatmul.msk.f32.gmra.mxu0 %vm94_vm1, %v23_v12  ;;  %797 = vmatmul.msk.f32.gmra.mxu2 %vm94_vm1, %v53_v13  ;;  %v65_v61 = vld [vmem:[%s1425_s0 + $0x160] sm:$0xff]  ;;  %v50_v63 = vld [vmem:[%s1425_s0 + $0xe8] sm:$0xff]  ;;  %v83_v2 = vld [vmem:[%s1425_s0 + $0x1f0] sm:$0xff] }
  0x1c   :  { %v66_v1 = vld [vmem:[%s1425_s0 + $0x168] sm:$0xff]  ;;  %v67_v4 = vld [vmem:[%s1425_s0 + $0x170] sm:$0xff]  ;;  %v1178_v5 = vld [vmem:[%s1427_s2] ss:$0 sm:$0xff] }
  0x1d   :  { %814 = vmatmul.msk.f32.gmra.mxu3 %vm94_vm1, %v70_v14  ;;  %783 = vmatmul.msk.f32.gmra.mxu1 %vm94_vm1, %v39_v19  ;;  %v84_v7 = vld [vmem:[%s1425_s0 + $0x1f8] sm:$0xff] }
  0x23   :  { %768 = vmatmul.msk.f32.gmra.mxu0 %vm94_vm1, %v24_v16  ;;  %798 = vmatmul.msk.f32.gmra.mxu2 %vm94_vm1, %v54_v17 }
  0x25   :  { %815 = vmatmul.msk.f32.gmra.mxu3 %vm94_vm1, %v71_v18  ;;  %784 = vmatmul.msk.f32.gmra.mxu1 %vm94_vm1, %v40_v23 }
  0x2b   :  { %769 = vmatmul.msk.f32.gmra.mxu0 %vm94_vm1, %v25_v20  ;;  %799 = vmatmul.msk.f32.gmra.mxu2 %vm94_vm1, %v55_v21 }
  0x2d   :  { %816 = vmatmul.msk.f32.gmra.mxu3 %vm94_vm1, %v72_v22  ;;  %785 = vmatmul.msk.f32.gmra.mxu1 %vm94_vm1, %v41_v27 }
  0x33   :  { %770 = vmatmul.msk.f32.gmra.mxu0 %vm94_vm1, %v26_v24  ;;  %800 = vmatmul.msk.f32.gmra.mxu2 %vm94_vm1, %v56_v25 }
  0x35   :  { %817 = vmatmul.msk.f32.gmra.mxu3 %vm94_vm1, %v73_v26  ;;  %786 = vmatmul.msk.f32.gmra.mxu1 %vm94_vm1, %v42_v31 }
  0x3b   :  { %771 = vmatmul.msk.f32.gmra.mxu0 %vm94_vm1, %v27_v28  ;;  %801 = vmatmul.msk.f32.gmra.mxu2 %vm94_vm1, %v57_v29 }
  0x3d   :  { %818 = vmatmul.msk.f32.gmra.mxu3 %vm94_vm1, %v74_v30  ;;  %787 = vmatmul.msk.f32.gmra.mxu1 %vm94_vm1, %v43_v35 }
  0x43   :  { %772 = vmatmul.msk.f32.gmra.mxu0 %vm94_vm1, %v28_v32  ;;  %802 = vmatmul.msk.f32.gmra.mxu2 %vm94_vm1, %v58_v33 }
  0x45   :  { %819 = vmatmul.msk.f32.gmra.mxu3 %vm94_vm1, %v75_v34  ;;  %788 = vmatmul.msk.f32.gmra.mxu1 %vm94_vm1, %v44_v39 }
  0x4b   :  { %773 = vmatmul.msk.f32.gmra.mxu0 %vm94_vm1, %v29_v36  ;;  %803 = vmatmul.msk.f32.gmra.mxu2 %vm94_vm1, %v59_v37 }
  0x4d   :  { %820 = vmatmul.msk.f32.gmra.mxu3 %vm94_vm1, %v76_v38  ;;  %789 = vmatmul.msk.f32.gmra.mxu1 %vm94_vm1, %v45_v43 }
  0x53   :  { %774 = vmatmul.msk.f32.gmra.mxu0 %vm94_vm1, %v30_v40  ;;  %804 = vmatmul.msk.f32.gmra.mxu2 %vm94_vm1, %v60_v41 }
  0x55   :  { %821 = vmatmul.msk.f32.gmra.mxu3 %vm94_vm1, %v77_v42  ;;  %790 = vmatmul.msk.f32.gmra.mxu1 %vm94_vm1, %v46_v47 }
  0x5b   :  { %775 = vmatmul.msk.f32.gmra.mxu0 %vm94_vm1, %v31_v44  ;;  %805 = vmatmul.msk.f32.gmra.mxu2 %vm94_vm1, %v61_v45 }
  0x5d   :  { %822 = vmatmul.msk.f32.gmra.mxu3 %vm94_vm1, %v78_v46  ;;  %791 = vmatmul.msk.f32.gmra.mxu1 %vm94_vm1, %v47_v51 }
  0x63   :  { %776 = vmatmul.msk.f32.gmra.mxu0 %vm94_vm1, %v32_v48  ;;  %806 = vmatmul.msk.f32.gmra.mxu2 %vm94_vm1, %v62_v49 }
  0x65   :  { %823 = vmatmul.msk.f32.gmra.mxu3 %vm94_vm1, %v79_v50  ;;  %792 = vmatmul.msk.f32.gmra.mxu1 %vm94_vm1, %v48_v55 }
  0x6b   :  { %777 = vmatmul.msk.f32.gmra.mxu0 %vm94_vm1, %v33_v52  ;;  %807 = vmatmul.msk.f32.gmra.mxu2 %vm94_vm1, %v63_v53 }
  0x6d   :  { %824 = vmatmul.msk.f32.gmra.mxu3 %vm94_vm1, %v80_v54  ;;  %793 = vmatmul.msk.f32.gmra.mxu1 %vm94_vm1, %v49_v59 }
  0x73   :  { %778 = vmatmul.msk.f32.gmra.mxu0 %vm94_vm1, %v34_v56  ;;  %808 = vmatmul.msk.f32.gmra.mxu2 %vm94_vm1, %v64_v57 }
  0x75   :  { %825 = vmatmul.msk.f32.gmra.mxu3 %vm94_vm1, %v81_v58  ;;  %794 = vmatmul.msk.f32.gmra.mxu1 %vm94_vm1, %v50_v63 }
  0x7b   :  { %779 = vmatmul.msk.f32.gmra.mxu0 %vm94_vm1, %v35_v60  ;;  %809 = vmatmul.msk.f32.gmra.mxu2 %vm94_vm1, %v65_v61 }
  0x7d   :  { %826 = vmatmul.msk.f32.gmra.mxu3 %vm94_vm1, %v82_v62 }
  0x83   :  { %780 = vmatmul.msk.f32.gmra.mxu0 %vm94_vm1, %v36_v0  ;;  %810 = vmatmul.msk.f32.gmra.mxu2 %vm94_vm1, %v66_v1  ;;  %v715_v0 = vld [vmem:[%s1428_s3 + $0x18] sm:$0xff] }
  0x84   :  { %738 = vmatpush.msrb.mxu1 %v715_v0 }
  0x85   :  { %827 = vmatmul.msk.f32.gmra.mxu3 %vm94_vm1, %v83_v2 }
  0x88   :  { %v308_v3 = vpop.f32.mrf.mxu0 }
  0x89   :  { %v309_v6 = vadd.f32 %v1178_v5, %v308_v3 }
  0x8a   :  { %v1192_v15 = vpop.f32.mrf.mxu1 }
  0x8b   :  { %811 = vmatmul.msk.f32.gmra.mxu2 %vm94_vm1, %v67_v4  ;;  %v500_v9 = vmax.f32 %v309_v6, 0.0 }
  0x8d   :  { %828 = vmatmul.msk.f32.gmra.mxu3 %vm94_vm1, %v84_v7  ;;  %v565_v13 = vsel %vm564_vm2, %v500_v9, 0.0 }
  0x8e   :  { %v1186_v8 = vpop.f32.mrf.mxu2 }
  0x90   :  { %v311_v10 = vpop.f32.mrf.mxu0  ;;  %v1188_v11 = vpop.f32.mrf.mxu3 }
  0x91   :  { %v312_v12 = vadd.f32 %v1178_v5, %v311_v10 }
  0x92   :  { %v1200_v23 = vpop.f32.mrf.mxu1 }
  0x93   :  { %v501_v14 = vmax.f32 %v312_v12, 0.0 }
  0x95   :  { %v566_v16 = vsel %vm564_vm2, %v501_v14, 0.0 }
  0x96   :  { %v567_v17 = vadd.f32 %v566_v16, %v565_v13  ;;  %v1195_v18 = vpop.f32.mrf.mxu2  ;;  %v714_v16 = vld [vmem:[%s1428_s3 + $0x10] sm:$0xff] }
  0x97   :  { %739 = vmatpush.msrb.mxu1 %v714_v16 }
  0x98   :  { %v314_v19 = vpop.f32.mrf.mxu0  ;;  %v1197_v20 = vpop.f32.mrf.mxu3 }
  0x99   :  { %v315_v21 = vadd.f32 %v1178_v5, %v314_v19 }
  0x9a   :  { %v1208_v33 = vpop.f32.mrf.mxu1 }
  0x9b   :  { %v502_v22 = vmax.f32 %v315_v21, 0.0 }
  0x9d   :  { %v568_v24 = vsel %vm564_vm2, %v502_v22, 0.0 }
  0x9e   :  { %v569_v25 = vadd.f32 %v568_v24, %v567_v17  ;;  %v404_v26 = vpop.f32.mrf.mxu2 }
  0x9f   :  { %v405_v30 = vadd.f32 %v1178_v5, %v404_v26 }
  0xa0   :  { %v317_v27 = vpop.f32.mrf.mxu0  ;;  %v1203_v28 = vpop.f32.mrf.mxu3 }
  0xa1   :  { %v318_v29 = vadd.f32 %v1178_v5, %v317_v27  ;;  %v532_v36 = vmax.f32 %v405_v30, 0.0 }
  0xa2   :  { %v1218_v50 = vpop.f32.mrf.mxu1 }
  0xa3   :  { %v503_v31 = vmax.f32 %v318_v29, 0.0  ;;  %v634_v42 = vsel %vm564_vm2, %v532_v36, 0.0 }
  0xa5   :  { %v570_v32 = vsel %vm564_vm2, %v503_v31, 0.0 }
  0xa6   :  { %v571_v34 = vadd.f32 %v570_v32, %v569_v25  ;;  %v407_v35 = vpop.f32.mrf.mxu2 }
  0xa7   :  { %v408_v37 = vadd.f32 %v1178_v5, %v407_v35 }
  0xa8   :  { %v320_v38 = vpop.f32.mrf.mxu0  ;;  %v1211_v39 = vpop.f32.mrf.mxu3 }
  0xa9   :  { %v533_v40 = vmax.f32 %v408_v37, 0.0  ;;  %v321_v41 = vadd.f32 %v1178_v5, %v320_v38 }
  0xaa   :  { %v1224_v60 = vpop.f32.mrf.mxu1 }
  0xab   :  { %v635_v43 = vsel %vm564_vm2, %v533_v40, 0.0  ;;  %v504_v44 = vmax.f32 %v321_v41, 0.0 }
  0xac   :  { %v636_v45 = vadd.f32 %v635_v43, %v634_v42 }
  0xad   :  { %v572_v46 = vsel %vm564_vm2, %v504_v44, 0.0 }
  0xae   :  { %v573_v47 = vadd.f32 %v572_v46, %v571_v34  ;;  %v410_v48 = vpop.f32.mrf.mxu2 }
  0xaf   :  { %v411_v49 = vadd.f32 %v1178_v5, %v410_v48 }
  0xb0   :  { %v323_v51 = vpop.f32.mrf.mxu0  ;;  %v1220_v52 = vpop.f32.mrf.mxu3 }
  0xb1   :  { %v534_v53 = vmax.f32 %v411_v49, 0.0  ;;  %v324_v29 = vadd.f32 %v1178_v5, %v323_v51 }
  0xb2   :  { %v1234_v3 = vpop.f32.mrf.mxu1 }
  0xb3   :  { %v637_v54 = vsel %vm564_vm2, %v534_v53, 0.0  ;;  %v505_v32 = vmax.f32 %v324_v29, 0.0 }
  0xb4   :  { %v638_v55 = vadd.f32 %v637_v54, %v636_v45 }
  0xb5   :  { %v574_v41 = vsel %vm564_vm2, %v505_v32, 0.0 }
  0xb6   :  { %v413_v56 = vpop.f32.mrf.mxu2  ;;  %v575_v49 = vadd.f32 %v574_v41, %v573_v47 }
  0xb7   :  { %v414_v57 = vadd.f32 %v1178_v5, %v413_v56 }
  0xb8   :  { %v326_v58 = vpop.f32.mrf.mxu0  ;;  %v1226_v61 = vpop.f32.mrf.mxu3 }
  0xb9   :  { %v535_v59 = vmax.f32 %v414_v57, 0.0  ;;  %v327_v31 = vadd.f32 %v1178_v5, %v326_v58 }
  0xba   :  { %v1238_v9 = vpop.f32.mrf.mxu1 }
  0xbb   :  { %v639_v62 = vsel %vm564_vm2, %v535_v59, 0.0  ;;  %v506_v37 = vmax.f32 %v327_v31, 0.0 }
  0xbc   :  { %v1229_v63 = vadd.f32 %v639_v62, %v638_v55 }
  0xbd   :  { %v576_v45 = vsel %vm564_vm2, %v506_v37, 0.0 }
  0xbe   :  { %v416_v1 = vpop.f32.mrf.mxu2  ;;  %v577_v55 = vadd.f32 %v576_v45, %v575_v49  ;;  %v1287_v49 = vadd.f32 %v1178_v5, %v1188_v11 }
  0xbf   :  { %v417_v56 = vadd.f32 %v1178_v5, %v416_v1 }
  0xc0   :  { %v329_v2 = vpop.f32.mrf.mxu0  ;;  %v1236_v4 = vpop.f32.mrf.mxu3 }
  0xc1   :  { %v330_v34 = vadd.f32 %v1178_v5, %v329_v2  ;;  %v536_v31 = vmax.f32 %v417_v56, 0.0 }
  0xc2   :  { %v1245_v17 = vpop.f32.mrf.mxu1 }
  0xc3   :  { %v507_v42 = vmax.f32 %v330_v34, 0.0 }
  0xc5   :  { %v578_v51 = vsel %vm564_vm2, %v507_v42, 0.0 }
  0xc6   :  { %v419_v6 = vpop.f32.mrf.mxu2  ;;  %v579_v0 = vadd.f32 %v578_v51, %v577_v55  ;;  %v357_v51 = vadd.f32 %v1178_v5, %v1192_v15 }
  0xc7   :  { %v420_v47 = vadd.f32 %v1178_v5, %v419_v6 }
  0xc8   :  { %v332_v7 = vpop.f32.mrf.mxu0  ;;  %v1240_v12 = vpop.f32.mrf.mxu3 }
  0xc9   :  { %v333_v38 = vadd.f32 %v1178_v5, %v332_v7 }
  0xca   :  { %v1249_v25 = vpop.f32.mrf.mxu1 }
  0xcb   :  { %v508_v46 = vmax.f32 %v333_v38, 0.0  ;;  %v537_v38 = vmax.f32 %v420_v47, 0.0  ;;  %v713_v47 = vld [vmem:[%s1428_s3 + $0x8] sm:$0xff] }
  0xcc   :  { %740 = vmatpush.msrb.mxu1 %v713_v47 }
  0xcd   :  { %v580_v57 = vsel %vm564_vm2, %v508_v46, 0.0 }
  0xce   :  { %v422_v10 = vpop.f32.mrf.mxu2 }
  0xcf   :  { %v423_v1 = vadd.f32 %v1178_v5, %v422_v10 }
  0xd0   :  { %v335_v13 = vpop.f32.mrf.mxu0  ;;  %v1247_v21 = vpop.f32.mrf.mxu3 }
  0xd1   :  { %v336_v43 = vadd.f32 %v1178_v5, %v335_v13 }
  0xd2   :  { %v1256_v35 = vpop.f32.mrf.mxu1 }
  0xd3   :  { %v509_v53 = vmax.f32 %v336_v43, 0.0  ;;  %v538_v43 = vmax.f32 %v423_v1, 0.0 }
  0xd5   :  { %v582_v13 = vsel %vm564_vm2, %v509_v53, 0.0 }
  0xd6   :  { %v425_v14 = vpop.f32.mrf.mxu2 }
  0xd7   :  { %v426_v41 = vadd.f32 %v1178_v5, %v425_v14 }
  0xd8   :  { %v338_v19 = vpop.f32.mrf.mxu0  ;;  %v1251_v26 = vpop.f32.mrf.mxu3 }
  0xd9   :  { %v339_v48 = vadd.f32 %v1178_v5, %v338_v19  ;;  %v539_v55 = vmax.f32 %v426_v41, 0.0 }
  0xda   :  { %v1270_v62 = vpop.f32.mrf.mxu1 }
  0xdb   :  { %v510_v58 = vmax.f32 %v339_v48, 0.0 }
  0xde   :  { %v428_v22 = vpop.f32.mrf.mxu2 }
  0xdf   :  { %v429_v10 = vadd.f32 %v1178_v5, %v428_v22 }
  0xe0   :  { %v341_v24 = vpop.f32.mrf.mxu0  ;;  %v1258_v36 = vpop.f32.mrf.mxu3 }
  0xe1   :  { %v342_v54 = vadd.f32 %v1178_v5, %v341_v24  ;;  %v581_v24 = vadd.f32 %v580_v57, %v579_v0 }
  0xe2   :  { %v1294_v22 = vpop.f32.mrf.mxu1 }
  0xe3   :  { %v511_v16 = vmax.f32 %v342_v54, 0.0  ;;  %v583_v37 = vadd.f32 %v582_v13, %v581_v24  ;;  %v643_v54 = vsel %vm564_vm2, %v537_v38, 0.0 }
  0xe5   :  { %v586_v6 = vsel %vm564_vm2, %v511_v16, 0.0 }
  0xe6   :  { %v431_v27 = vpop.f32.mrf.mxu2 }
  0xe7   :  { %v432_v56 = vadd.f32 %v1178_v5, %v431_v27  ;;  %v540_v27 = vmax.f32 %v429_v10, 0.0 }
  0xe8   :  { %v344_v30 = vpop.f32.mrf.mxu0  ;;  %v1272_v7 = vpop.f32.mrf.mxu3 }
  0xe9   :  { %v345_v59 = vadd.f32 %v1178_v5, %v344_v30  ;;  %v584_v30 = vsel %vm564_vm2, %v510_v58, 0.0  ;;  %v360_v58 = vadd.f32 %v1178_v5, %v1200_v23  ;;  %v516_v23 = vmax.f32 %v357_v51, 0.0 }
  0xea   :  { %v585_v45 = vadd.f32 %v584_v30, %v583_v37  ;;  %v541_v30 = vmax.f32 %v432_v56, 0.0  ;;  %v392_v47 = vpop.f32.mrf.mxu1 }
  0xeb   :  { %v512_v32 = vmax.f32 %v345_v59, 0.0  ;;  %v645_v59 = vsel %vm564_vm2, %v538_v43, 0.0  ;;  %v517_v37 = vmax.f32 %v360_v58, 0.0 }
  0xec   :  { %v587_v14 = vadd.f32 %v586_v6, %v585_v45  ;;  %v649_v6 = vsel %vm564_vm2, %v540_v27, 0.0  ;;  %v596_v45 = vsel %vm564_vm2, %v516_v23, 0.0 }
  0xed   :  { %v588_v46 = vsel %vm564_vm2, %v512_v32, 0.0 }
  0xee   :  { %v434_v40 = vpop.f32.mrf.mxu2  ;;  %v589_v0 = vadd.f32 %v588_v46, %v587_v14 }
  0xef   :  { %v435_v16 = vadd.f32 %v1178_v5, %v434_v40  ;;  %v366_v40 = vadd.f32 %v1178_v5, %v1218_v50  ;;  %v651_v50 = vsel %vm564_vm2, %v541_v30, 0.0 }
  0xf0   :  { %v347_v44 = vpop.f32.mrf.mxu0  ;;  %v1303_v13 = vpop.f32.mrf.mxu3 }
  0xf1   :  { %v348_v19 = vadd.f32 %v1178_v5, %v347_v44  ;;  %v641_v44 = vsel %vm564_vm2, %v536_v31, 0.0  ;;  %v647_v31 = vsel %vm564_vm2, %v539_v55, 0.0  ;;  %v519_v56 = vmax.f32 %v366_v40, 0.0 }
  0xf2   :  { %v642_v11 = vadd.f32 %v641_v44, %v1229_v63  ;;  %v363_v63 = vadd.f32 %v1178_v5, %v1208_v33 }
  0xf3   :  { %v513_v42 = vmax.f32 %v348_v19, 0.0 }
  0xf4   :  { %v644_v1 = vadd.f32 %v643_v54, %v642_v11  ;;  %v518_v44 = vmax.f32 %v363_v63, 0.0  ;;  %v598_v54 = vsel %vm564_vm2, %v517_v37, 0.0 }
  0xf5   :  { %v590_v57 = vsel %vm564_vm2, %v513_v42, 0.0  ;;  %v542_v42 = vmax.f32 %v435_v16, 0.0 }
  0xf6   :  { %v437_v2 = vpop.f32.mrf.mxu2  ;;  %v646_v38 = vadd.f32 %v645_v59, %v644_v1  ;;  %v547_v59 = vmax.f32 %v1287_v49, 0.0  ;;  %v600_v16 = vsel %vm564_vm2, %v518_v44, 0.0  ;;  %v602_v49 = vsel %vm564_vm2, %v519_v56, 0.0 }
  0xf7   :  { %v438_v32 = vadd.f32 %v1178_v5, %v437_v2  ;;  %v653_v58 = vsel %vm564_vm2, %v542_v42, 0.0 }
  0xf8   :  { %v350_v29 = vpop.f32.mrf.mxu0  ;;  %v648_v10 = vadd.f32 %v647_v31, %v646_v38  ;;  %v1329_v27 = vpop.f32.mrf.mxu3  ;;  %v663_v30 = vsel %vm564_vm2, %v547_v59, 0.0  ;;  %v393_v59 = vadd.f32 %v1178_v5, %v392_v47 }
  0xf9   :  { %v351_v34 = vadd.f32 %v1178_v5, %v350_v29  ;;  %v591_v29 = vadd.f32 %v590_v57, %v589_v0  ;;  %v543_v51 = vmax.f32 %v438_v32, 0.0  ;;  %v372_v57 = vadd.f32 %v1178_v5, %v1234_v3 }
  0xfa   :  { %v650_v55 = vadd.f32 %v649_v6, %v648_v10  ;;  %v453_v3 = vadd.f32 %v1178_v5, %v1197_v20  ;;  %v381_v20 = vadd.f32 %v1178_v5, %v1249_v25  ;;  %v384_v10 = vadd.f32 %v1178_v5, %v1256_v35 }
  0xfb   :  { %v514_v48 = vmax.f32 %v351_v34, 0.0  ;;  %v459_v25 = vadd.f32 %v1178_v5, %v1211_v39 }
  0xfc   :  { %v652_v0 = vadd.f32 %v651_v50, %v650_v55  ;;  %v548_v42 = vmax.f32 %v453_v3, 0.0 }
  0xfd   :  { %v592_v19 = vsel %vm564_vm2, %v514_v48, 0.0  ;;  %v369_v48 = vadd.f32 %v1178_v5, %v1224_v60  ;;  %v375_v60 = vadd.f32 %v1178_v5, %v1238_v9  ;;  %v378_v9 = vadd.f32 %v1178_v5, %v1245_v17 }
  0xfe   :  { %v440_v53 = vpop.f32.mrf.mxu2  ;;  %v593_v41 = vadd.f32 %v592_v19, %v591_v29  ;;  %v654_v63 = vadd.f32 %v653_v58, %v652_v0  ;;  %v521_v29 = vmax.f32 %v372_v57, 0.0  ;;  %v456_v17 = vadd.f32 %v1178_v5, %v1203_v28  ;;  %v395_v57 = vpop.f32.mrf.mxu1  ;;  %v712_v58 = vld [vmem:[%s1428_s3] sm:$0xff] }
  0xff   :  { %v441_v43 = vadd.f32 %v1178_v5, %v440_v53  ;;  %v520_v19 = vmax.f32 %v369_v48, 0.0  ;;  %v522_v32 = vmax.f32 %v375_v60, 0.0  ;;  %v523_v44 = vmax.f32 %v378_v9, 0.0  ;;  %741 = vmatpush.msrb.mxu1 %v712_v58 }
 0x100   :  { %v353_v15 = vpop.f32.mrf.mxu0  ;;  %v387_v28 = vadd.f32 %v1178_v5, %v1270_v62  ;;  %v665_v55 = vsel %vm564_vm2, %v548_v42, 0.0  ;;  %v549_v35 = vmax.f32 %v456_v17, 0.0  ;;  %v1359_v39 = vpop.f32.mrf.mxu3  ;;  %v462_v62 = vadd.f32 %v1178_v5, %v1220_v52 }
 0x101   :  { %v354_v24 = vadd.f32 %v1178_v5, %v353_v15  ;;  %v544_v11 = vmax.f32 %v441_v43, 0.0  ;;  %v604_v38 = vsel %vm564_vm2, %v520_v19, 0.0  ;;  %v550_v60 = vmax.f32 %v459_v25, 0.0 }
 0x102   :  { %v465_v0 = vadd.f32 %v1178_v5, %v1226_v61  ;;  %v396_v3 = vadd.f32 %v1178_v5, %v395_v57  ;;  %v399_v52 = vadd.f32 %v1178_v5, %v1186_v8  ;;  %v528_v9 = vmax.f32 %v393_v59, 0.0 }
 0x103   :  { %v515_v34 = vmax.f32 %v354_v24, 0.0  ;;  %v655_v24 = vsel %vm564_vm2, %v543_v51, 0.0  ;;  %v657_v31 = vsel %vm564_vm2, %v544_v11, 0.0  ;;  %v524_v51 = vmax.f32 %v381_v20, 0.0 }
 0x104   :  { %v610_v11 = vsel %vm564_vm2, %v523_v44, 0.0  ;;  %v402_v20 = vadd.f32 %v1178_v5, %v1195_v18  ;;  %v474_v17 = vadd.f32 %v1178_v5, %v1247_v21  ;;  %v477_v18 = vadd.f32 %v1178_v5, %v1251_v26 }
 0x105   :  { %v594_v33 = vsel %vm564_vm2, %v515_v34, 0.0  ;;  %v656_v34 = vadd.f32 %v655_v24, %v654_v63  ;;  %v612_v19 = vsel %vm564_vm2, %v524_v51, 0.0  ;;  %v526_v24 = vmax.f32 %v387_v28, 0.0 }
 0x106   :  { %v595_v46 = vadd.f32 %v594_v33, %v593_v41  ;;  %v443_v2 = vpop.f32.mrf.mxu2  ;;  %v667_v63 = vsel %vm564_vm2, %v549_v35, 0.0  ;;  %v555_v21 = vmax.f32 %v474_v17, 0.0  ;;  %v480_v28 = vadd.f32 %v1178_v5, %v1258_v36 }
 0x107   :  { %v444_v14 = vadd.f32 %v1178_v5, %v443_v2  ;;  %v658_v43 = vadd.f32 %v657_v31, %v656_v34  ;;  %v608_v2 = vsel %vm564_vm2, %v522_v32, 0.0  ;;  %v669_v31 = vsel %vm564_vm2, %v550_v60, 0.0 }
 0x108   :  { %v597_v53 = vadd.f32 %v596_v45, %v595_v46  ;;  %v606_v45 = vsel %vm564_vm2, %v521_v29, 0.0  ;;  %v468_v29 = vadd.f32 %v1178_v5, %v1236_v4  ;;  %v616_v8 = vsel %vm564_vm2, %v526_v24, 0.0  ;;  %v494_v44 = vpop.f32.mrf.mxu3 }
 0x109   :  { %v545_v23 = vmax.f32 %v444_v14, 0.0  ;;  %v390_v14 = vadd.f32 %v1178_v5, %v1294_v22  ;;  %v525_v22 = vmax.f32 %v384_v10, 0.0  ;;  %v483_v26 = vadd.f32 %v1178_v5, %v1272_v7 }
 0x10a   :  { %v599_v15 = vadd.f32 %v598_v54, %v597_v53  ;;  %v553_v42 = vmax.f32 %v468_v29, 0.0  ;;  %v486_v36 = vadd.f32 %v1178_v5, %v1303_v13 }
 0x10b   :  { %v659_v41 = vsel %vm564_vm2, %v545_v23, 0.0  ;;  %v527_v23 = vmax.f32 %v390_v14, 0.0  ;;  %v614_v61 = vsel %vm564_vm2, %v525_v22, 0.0 }
 0x10c   :  { %v601_v1 = vadd.f32 %v600_v16, %v599_v15  ;;  %v660_v50 = vadd.f32 %v659_v41, %v658_v43  ;;  %v620_v43 = vsel %vm564_vm2, %v528_v9, 0.0  ;;  %v675_v51 = vsel %vm564_vm2, %v553_v42, 0.0 }
 0x10e   :  { %v603_v37 = vadd.f32 %v602_v49, %v601_v1  ;;  %v446_v40 = vpop.f32.mrf.mxu2  ;;  %v551_v49 = vmax.f32 %v462_v62, 0.0  ;;  %v679_v62 = vsel %vm564_vm2, %v555_v21, 0.0 }
 0x10f   :  { %v447_v6 = vadd.f32 %v1178_v5, %v446_v40  ;;  %v618_v40 = vsel %vm564_vm2, %v527_v23, 0.0  ;;  %v559_v23 = vmax.f32 %v486_v36, 0.0 }
 0x110   :  { %v605_v33 = vadd.f32 %v604_v38, %v603_v37  ;;  %v471_v37 = vadd.f32 %v1178_v5, %v1240_v12  ;;  %v529_v38 = vmax.f32 %v396_v3, 0.0  ;;  %v497_v7 = vpop.f32.mrf.mxu3  ;;  %v492_v3 = vadd.f32 %v1178_v5, %v1359_v39 }
 0x111   :  { %v546_v46 = vmax.f32 %v447_v6, 0.0  ;;  %v671_v6 = vsel %vm564_vm2, %v551_v49, 0.0  ;;  %v687_v29 = vsel %vm564_vm2, %v559_v23, 0.0 }
 0x112   :  { %v607_v48 = vadd.f32 %v606_v45, %v605_v33  ;;  %v530_v33 = vmax.f32 %v399_v52, 0.0  ;;  %v622_v25 = vsel %vm564_vm2, %v529_v38, 0.0 }
 0x113   :  { %v661_v54 = vsel %vm564_vm2, %v546_v46, 0.0  ;;  %v554_v46 = vmax.f32 %v471_v37, 0.0 }
 0x114   :  { %v609_v53 = vadd.f32 %v608_v2, %v607_v48  ;;  %v662_v56 = vadd.f32 %v661_v54, %v660_v50  ;;  %v531_v2 = vmax.f32 %v402_v20, 0.0 }
 0x115   :  { %v677_v35 = vsel %vm564_vm2, %v554_v46, 0.0 }
 0x116   :  { %v611_v15 = vadd.f32 %v610_v11, %v609_v53  ;;  %v664_v16 = vadd.f32 %v663_v30, %v662_v56  ;;  %v552_v30 = vmax.f32 %v465_v0, 0.0  ;;  %v556_v53 = vmax.f32 %v477_v18, 0.0 }
 0x117   :  { %v626_v56 = vsel %vm564_vm2, %v531_v2, 0.0  ;;  %v557_v11 = vmax.f32 %v480_v28, 0.0  ;;  %v558_v0 = vmax.f32 %v483_v26, 0.0  ;;  %v848_v28 = vld [vmem:[%s1429_s4] ss:$0 sm:$0xff] }
 0x118   :  { %v613_v1 = vadd.f32 %v612_v19, %v611_v15  ;;  %v666_v47 = vadd.f32 %v665_v55, %v664_v16  ;;  %v673_v10 = vsel %vm564_vm2, %v552_v30, 0.0  ;;  %v624_v55 = vsel %vm564_vm2, %v530_v33, 0.0 }
 0x119   :  { %v681_v60 = vsel %vm564_vm2, %v556_v53, 0.0  ;;  %v489_v15 = vadd.f32 %v1178_v5, %v1329_v27  ;;  %v877_v19 = vmov 256.0   ;;  %v683_v24 = vsel %vm564_vm2, %v557_v11, 0.0 }
 0x11a   :  { %v615_v32 = vadd.f32 %v614_v61, %v613_v1  ;;  %v668_v34 = vadd.f32 %v667_v63, %v666_v47  ;;  %849 = vrcp.f32 %v877_v19  ;;  %v685_v13 = vsel %vm564_vm2, %v558_v0, 0.0 }
 0x11b   :  { %v560_v63 = vmax.f32 %v489_v15, 0.0  ;;  %v495_v1 = vadd.f32 %v1178_v5, %v494_v44  ;;  %v498_v47 = vadd.f32 %v1178_v5, %v497_v7  ;;  %v561_v61 = vmax.f32 %v492_v3, 0.0 }
 0x11c   :  { %v617_v4 = vadd.f32 %v616_v8, %v615_v32  ;;  %v670_v41 = vadd.f32 %v669_v31, %v668_v34 }
 0x11d   :  { %v689_v30 = vsel %vm564_vm2, %v560_v63, 0.0  ;;  %v562_v32 = vmax.f32 %v495_v1, 0.0  ;;  %v563_v34 = vmax.f32 %v498_v47, 0.0  ;;  %v691_v8 = vsel %vm564_vm2, %v561_v61, 0.0 }
 0x11e   :  { %v619_v12 = vadd.f32 %v618_v40, %v617_v4  ;;  %v672_v45 = vadd.f32 %v671_v6, %v670_v41 }
 0x11f   :  { %v693_v20 = vsel %vm564_vm2, %v562_v32, 0.0  ;;  %v695_v5 = vsel %vm564_vm2, %v563_v34, 0.0 }
 0x120   :  { %v674_v48 = vadd.f32 %v673_v10, %v672_v45  ;;  %v621_v50 = vadd.f32 %v620_v43, %v619_v12  ;;  %v850_v9 = vpop.eup %849 }
 0x121   :  { %v704_v40 = vmul.f32 256.0, %v850_v9  ;;  %vm708_vm3 = vweird.f32 %v850_v9 }
 0x122   :  { %v676_v14 = vadd.f32 %v675_v51, %v674_v48  ;;  %v623_v54 = vadd.f32 %v622_v25, %v621_v50 }
 0x123   :  { %v705_v6 = vsub.f32 1.0, %v704_v40 }
 0x124   :  { %v678_v57 = vadd.f32 %v677_v35, %v676_v14  ;;  %v625_v58 = vadd.f32 %v624_v55, %v623_v54 }
 0x125   :  { %v706_v33 = vmul.f32 %v850_v9, %v705_v6 }
 0x126   :  { %v680_v22 = vadd.f32 %v679_v62, %v678_v57  ;;  %v627_v59 = vadd.f32 %v626_v56, %v625_v58 }
 0x127   :  { %v707_v10 = vadd.f32 %v850_v9, %v706_v33 }
 0x128   :  { %v682_v16 = vadd.f32 %v681_v60, %v680_v22  ;;  %v628_v27 = vrot.slane %v627_v59, 4 }
 0x129   :  { %v709_v2 = vsel %vm708_vm3, %v850_v9, %v707_v10 }
 0x12a   :  { %v684_v52 = vadd.f32 %v683_v24, %v682_v16  ;;  %v629_v37 = vadd.f32 %v628_v27, %v627_v59 }
 0x12c   :  { %v686_v49 = vadd.f32 %v685_v13, %v684_v52  ;;  %v630_v4 = vrot.slane %v629_v37, 2 }
 0x12e   :  { %v688_v31 = vadd.f32 %v687_v29, %v686_v49  ;;  %v631_v43 = vadd.f32 %v630_v4, %v629_v37 }
 0x130   :  { %v690_v39 = vadd.f32 %v689_v30, %v688_v31  ;;  %v632_v44 = vrot.slane %v631_v43, 1 }
 0x132   :  { %v692_v38 = vadd.f32 %v691_v8, %v690_v39  ;;  %v633_v25 = vadd.f32 %v632_v44, %v631_v43 }
 0x134   :  { %v694_v41 = vadd.f32 %v693_v20, %v692_v38  ;;  %v710_v50 = vmul.f32 %v709_v2, %v633_v25 }
 0x136   :  { %v696_v42 = vadd.f32 %v695_v5, %v694_v41 }
 0x138   :  { %v697_v17 = vrot.slane %v696_v42, 4 }
 0x13a   :  { %v698_v12 = vadd.f32 %v697_v17, %v696_v42 }
 0x13c   :  { %v699_v45 = vrot.slane %v698_v12, 2 }
 0x13e   :  { %v700_v46 = vadd.f32 %v699_v45, %v698_v12 }
 0x140   :  { %v701_v18 = vrot.slane %v700_v46, 1 }
 0x142   :  { %v702_v48 = vadd.f32 %v701_v18, %v700_v46 }
 0x144   :  { %v711_v51 = vmul.f32 %v709_v2, %v702_v48 }
 0x146   :  { %v723_v21 = vsel %vm722_vm4, %v711_v51, %v710_v50 }
 0x147   :  { %829 = vmatmul.msk.f32.vlgmr.msrb.gmra.mxu1 %vm564_vm2, %v723_v21 }
 0x1c4   :  { %v743_v14 = vpop.f32.mrf.mxu1 }
 0x1c5   :  { %v744_v54 = vadd.f32 %v848_v28, %v743_v14 }
 0x1c7   :  { %747 = vst.msk [vmem:[#allocation2] sm:$0x3] %vm746_vm5, %v744_v54 }
 0x1c8   :  { %758 = dma.vmem_to_hbm [thread:$0]  %s754_s10, 32, %s756_s13, [#allocation3]  }
 0x1c9   :  { %875 = dma.done.wait [#allocation3], 32  }
 0x1ca   :  { %876 = vsyncadd [#allocation3], 4294967264 }
 0x1cb   :  { %763 = vsyncpa [#allocation3], 1 }

</bundles_post_ra>
